<compile_context>
chip_gen: v7x
topology: tpu7x:2x2x1
jax: 0.10.0
libtpu: 0.0.40
codegen_flags: <defaults>
</compile_context>

<pallas_src>
import jax
import jax.numpy as jnp
from jax.experimental import pallas as pl
from jax.experimental.pallas import tpu as pltpu

IN_FEATURES = 768     # BERT hidden size (module default)
OUT_FEATURES = 1      # single sentiment logit

# Tile targets: ~6 MiB per f32 input buffer -> fits v7x (64 MiB VMEM) with
# double-buffering and is comfortably under the scoped default on v5e/v6e.
TB_TARGET = 8
TS_TARGET = 256


def _pick_tile(n, cap, align):
    """Largest divisor of n that is <= cap and a multiple of `align` (else n)."""
    if n <= cap:
        return n
    for t in range(min(n, cap), 0, -1):
        if n % t == 0 and t % align == 0:
            return t
    return n


def sentiment_head_kernel(h_ref, w_ref, b_ref, o_ref, acc_ref):
    # h_ref: [TB, TS, H]   w_ref: [1, H] (pre-scaled by 1/S)
    # b_ref: [1, 1]        o_ref: [TB, 1]   acc_ref: [TB, H] f32 scratch
    j = pl.program_id(1)

    @pl.when(j == 0)
    def _():
        acc_ref[...] = jnp.zeros_like(acc_ref)

    # Pure accumulate over the sequence tile (f32 accumulation, bf16-safe).
    acc_ref[...] += jnp.sum(h_ref[...].astype(jnp.float32), axis=1)

    @pl.when(j == pl.num_programs(1) - 1)
    def _():
        # out_features == 1: VPU broadcast multiply + lane reduction (no MXU,
        # no zero-padded weight DMA).  Mean scale is already folded into w.
        logit = jnp.sum(acc_ref[...] * w_ref[...], axis=-1, keepdims=True)
        logit = logit + b_ref[...]
        o_ref[...] = jax.nn.sigmoid(logit).astype(o_ref.dtype)


def prepare_sentiment_params(fc_weight, fc_bias, seq_len):
    """One-time parameter prep (hoisted out of the per-call path).

    fc_weight: [1, H] (PyTorch layout), fc_bias: [1].
    Folds the 1/S mean scale into the weight; returns lane-dense [1, H] weight
    and [1, 1] bias, both f32.
    """
    w = (fc_weight.astype(jnp.float32) / jnp.float32(seq_len)).reshape(1, -1)
    b = fc_bias.astype(jnp.float32).reshape(1, 1)
    return w, b


def sentiment_head(hidden_states, w_scaled, b):
    """hidden_states: [B, S, H] (f32 or bf16), w_scaled: [1, H], b: [1, 1]."""
    B, S, H = hidden_states.shape

    tb = _pick_tile(B, TB_TARGET, 8)          # output sublane constraint
    ts = _pick_tile(S, TS_TARGET, 8)          # input sublane constraint
    grid = (B // tb, S // ts)

    out = pl.pallas_call(
        sentiment_head_kernel,
        out_shape=jax.ShapeDtypeStruct((B, OUT_FEATURES), jnp.float32),
        grid_spec=pltpu.PrefetchScalarGridSpec(
            num_scalar_prefetch=0,
            grid=grid,
            in_specs=[
                pl.BlockSpec((tb, ts, H), lambda i, j: (i, j, 0)),
                pl.BlockSpec((1, H), lambda i, j: (0, 0)),
                pl.BlockSpec((1, 1), lambda i, j: (0, 0)),
            ],
            out_specs=pl.BlockSpec((tb, OUT_FEATURES), lambda i, j: (i, 0)),
            scratch_shapes=[pltpu.VMEM((tb, H), jnp.float32)],
        ),
        compiler_params=pltpu.CompilerParams(
            dimension_semantics=("parallel", "arbitrary"),
            vmem_limit_bytes=64 * 1024 * 1024,
        ),
    )(hidden_states, w_scaled, b)

    return out                                     # [B, 1]


if __name__ == "__main__":
    key = jax.random.PRNGKey(0)
    k_ids, k_hidden, k_w, k_b = jax.random.split(key, 4)

    B, S, H = 2, 8, IN_FEATURES

    # Synthetic "BERT inputs" (feed the backbone, which is stubbed — see TODO).
    input_ids = jax.random.randint(k_ids, (B, S), 0, 1000, dtype=jnp.int32)
    attention_mask = jnp.ones((B, S), dtype=jnp.int32)

    # Deterministic stand-in for output.last_hidden_state ([B, S, 768]).
    last_hidden_state = jax.random.normal(k_hidden, (B, S, H), dtype=jnp.float32)

    # Deterministic nn.Linear(768, 1) parameters (PyTorch layout: weight [out, in]).
    bound = 1.0 / jnp.sqrt(jnp.float32(H))
    fc_weight = jax.random.uniform(k_w, (OUT_FEATURES, H),
                                   minval=-bound, maxval=bound, dtype=jnp.float32)
    fc_bias = jax.random.uniform(k_b, (OUT_FEATURES,),
                                 minval=-bound, maxval=bound, dtype=jnp.float32)

    # One-time parameter prep (hoisted out of the per-call path).
    w_scaled, b_prepped = prepare_sentiment_params(fc_weight, fc_bias, S)

    out = sentiment_head(last_hidden_state, w_scaled, b_prepped)
    out = jax.block_until_ready(out)

    # Pure-JAX reference check.
    ref = jax.nn.sigmoid(jnp.mean(last_hidden_state, axis=1) @ fc_weight.T + fc_bias)
    assert out.shape == (B, OUT_FEATURES)
    assert jnp.allclose(out, ref, atol=1e-5, rtol=1e-5), (out, ref)

    print("KERNEL_OK")
</pallas_src>

<mosaic_0001>
module attributes {stable_mosaic.version = 11 : i64} {
  func.func @sentiment_head_kernel(%arg0: i32, %arg1: i32, %arg2: memref<2x8x768xf32, #tpu.memory_space<vmem>>, %arg3: memref<1x768xf32, #tpu.memory_space<vmem>>, %arg4: memref<1x1xf32, #tpu.memory_space<vmem>>, %arg5: memref<2x1xf32, #tpu.memory_space<vmem>>, %arg6: memref<2x768xf32, #tpu.memory_space<vmem>>) attributes {dimension_semantics = [#tpu.dimension_semantics<parallel>, #tpu.dimension_semantics<arbitrary>], iteration_bounds = array<i64: 1, 1>, scalar_prefetch = 0 : i64, scratch_operands = 1 : i64, tpu.core_type = #tpu.core_type<tc>, window_params = [{transform_indices = @transform_0, window_bounds = array<i64: 2, 8, 768>}, {pipeline_mode = #tpu.pipeline_mode<synchronous>, transform_indices = @transform_1, window_bounds = array<i64: 1, 768>}, {pipeline_mode = #tpu.pipeline_mode<synchronous>, transform_indices = @transform_2, window_bounds = array<i64: 1, 1>}, {transform_indices = @transform_3, window_bounds = array<i64: 2, 1>}]} {
    %c0_i32 = arith.constant 0 : i32
    %0 = arith.cmpi eq, %arg1, %c0_i32 : i32
    %1 = arith.extui %0 : i1 to i32
    %c0_i32_0 = arith.constant 0 : i32
    %2 = arith.cmpi ne, %1, %c0_i32_0 : i32
    scf.if %2 {
      %cst_9 = arith.constant 0.000000e+00 : f32
      %11 = vector.broadcast %cst_9 : f32 to vector<2x768xf32>
      %c0_10 = arith.constant 0 : index
      %c0_11 = arith.constant 0 : index
      %12 = vector.load %arg6[%c0_10, %c0_11] : memref<2x768xf32, #tpu.memory_space<vmem>>, vector<2x768xf32>
      tpu.vector_store %arg6[%c0_10, %c0_11], %11 {strides = array<i32>} : memref<2x768xf32, #tpu.memory_space<vmem>>, vector<2x768xf32>,
    } else {
    }
    %c0 = arith.constant 0 : index
    %c0_1 = arith.constant 0 : index
    %3 = vector.load %arg6[%c0, %c0_1] : memref<2x768xf32, #tpu.memory_space<vmem>>, vector<2x768xf32>
    %c0_2 = arith.constant 0 : index
    %c0_3 = arith.constant 0 : index
    %c0_4 = arith.constant 0 : index
    %4 = vector.load %arg2[%c0_2, %c0_3, %c0_4] : memref<2x8x768xf32, #tpu.memory_space<vmem>>, vector<2x8x768xf32>
    %cst = arith.constant dense<0.000000e+00> : vector<2x768xf32>
    %5 = vector.multi_reduction <add>, %4, %cst [1] : vector<2x8x768xf32> to vector<2x768xf32>
    %6 = arith.addf %3, %5 : vector<2x768xf32>
    %c0_5 = arith.constant 0 : index
    %c0_6 = arith.constant 0 : index
    %7 = vector.load %arg6[%c0_5, %c0_6] : memref<2x768xf32, #tpu.memory_space<vmem>>, vector<2x768xf32>
    tpu.vector_store %arg6[%c0_5, %c0_6], %6 {strides = array<i32>} : memref<2x768xf32, #tpu.memory_space<vmem>>, vector<2x768xf32>,
    %c0_i32_7 = arith.constant 0 : i32
    %8 = arith.cmpi eq, %arg1, %c0_i32_7 : i32
    %9 = arith.extui %8 : i1 to i32
    %c0_i32_8 = arith.constant 0 : i32
    %10 = arith.cmpi ne, %9, %c0_i32_8 : i32
    scf.if %10 {
      %c0_9 = arith.constant 0 : index
      %c0_10 = arith.constant 0 : index
      %11 = vector.load %arg6[%c0_9, %c0_10] : memref<2x768xf32, #tpu.memory_space<vmem>>, vector<2x768xf32>
      %c0_11 = arith.constant 0 : index
      %c0_12 = arith.constant 0 : index
      %12 = vector.load %arg3[%c0_11, %c0_12] : memref<1x768xf32, #tpu.memory_space<vmem>>, vector<1x768xf32>
      %13 = vector.broadcast %12 : vector<1x768xf32> to vector<2x768xf32>
      %14 = arith.mulf %11, %13 : vector<2x768xf32>
      %cst_13 = arith.constant dense<0.000000e+00> : vector<2xf32>
      %15 = vector.multi_reduction <add>, %14, %cst_13 [1] : vector<2x768xf32> to vector<2xf32>
      %16 = vector.shape_cast %15 : vector<2xf32> to vector<2x1xf32>
      %c0_14 = arith.constant 0 : index
      %c0_15 = arith.constant 0 : index
      %17 = vector.load %arg4[%c0_14, %c0_15] : memref<1x1xf32, #tpu.memory_space<vmem>>, vector<1x1xf32>
      %18 = vector.broadcast %17 : vector<1x1xf32> to vector<2x1xf32>
      %19 = arith.addf %16, %18 : vector<2x1xf32>
      %20 = arith.negf %19 : vector<2x1xf32>
      %21 = math.exp %20 : vector<2x1xf32>
      %cst_16 = arith.constant 1.000000e+00 : f32
      %22 = vector.broadcast %cst_16 : f32 to vector<2x1xf32>
      %23 = arith.addf %22, %21 : vector<2x1xf32>
      %24 = arith.divf %22, %23 : vector<2x1xf32>
      %c0_17 = arith.constant 0 : index
      %c0_18 = arith.constant 0 : index
      %25 = vector.load %arg5[%c0_17, %c0_18] : memref<2x1xf32, #tpu.memory_space<vmem>>, vector<2x1xf32>
      tpu.vector_store %arg5[%c0_17, %c0_18], %24 {strides = array<i32>} : memref<2x1xf32, #tpu.memory_space<vmem>>, vector<2x1xf32>,
    } else {
    }
    return
  }
  func.func @transform_0(%arg0: i32, %arg1: i32) -> (i32, i32, i32) {
    %c0_i32 = arith.constant 0 : i32
    %c0_i32_0 = arith.constant 0 : i32
    return %arg0, %arg1, %c0_i32 : i32, i32, i32
  }
  func.func @transform_1(%arg0: i32, %arg1: i32) -> (i32, i32) {
    %c0_i32 = arith.constant 0 : i32
    %c0_i32_0 = arith.constant 0 : i32
    %c0_i32_1 = arith.constant 0 : i32
    return %c0_i32, %c0_i32_0 : i32, i32
  }
  func.func @transform_2(%arg0: i32, %arg1: i32) -> (i32, i32) {
    %c0_i32 = arith.constant 0 : i32
    %c0_i32_0 = arith.constant 0 : i32
    %c0_i32_1 = arith.constant 0 : i32
    return %c0_i32, %c0_i32_0 : i32, i32
  }
  func.func @transform_3(%arg0: i32, %arg1: i32) -> (i32, i32) {
    %c0_i32 = arith.constant 0 : i32
    %c0_i32_0 = arith.constant 0 : i32
    return %arg0, %c0_i32 : i32, i32
  }
}

</mosaic_0001>

<bundles_post_ra>
// kernel: tpu_custom_call.1
= control target key start
LH: loop header
LB: loop body
LE: loop exit
PB: predicated region body
PF: predicated region fallthrough
CT: control target
= control target key end

     0   :  { %s545_s0 = inlined_call_operand.hbm [shape: f32[2,8,768], index: 0, kind: input, shape index: {}]   ;;  %s546_s1 = inlined_call_operand.hbm [shape: f32[1,768], index: 1, kind: input, shape index: {}]   ;;  %s547_s2 = inlined_call_operand.<no memory space> [shape: f32[1,1], index: 2, kind: input, shape index: {}]   ;;  %s548_s3 = inlined_call_operand.hbm [shape: f32[2,1], index: 3, kind: output, shape index: {}]  }
   0x1   :  { %v8_v0 = vstv %s547_s2 }
   0x2   :  { %9 = vst [vmem:[#allocation3] sm:$0x1] %v8_v0 }
   0x3   :  { %10 = vsyncpa [#allocation5], 0 }
   0x4   :  { %11 = vsyncpa [#allocation8], 0 }
   0x5   :  { %12 = vsyncpa [#allocation6], 0  ;;  %s447_s14 = smov [#allocation4]   ;;  %s375_s18 = scalar_lea.hbm %s545_s0, 1536 }
   0x6   :  { %s18_s15 = sshll.u32 %s447_s14, 4  ;;  %p376_p0 = scmp.ne.s32.totalorder %s545_s0, %s375_s18  ;;  %s19_s15 = int_to_ptr.vmem [resolvable:$true] %s18_s15 }
   0x7   :  { %p379_p1 = scmp.lt.u32.totalorder %s375_s18, %s545_s0 }
   0x9   :  { %p381_p2 = pnand %p379_p1, %p376_p0 }
   0xb   :  { %384 = shalt.err (!%p381_p2)
}
   0xc   :  { %s385_s2 = scalar_lea.vmem %s19_s15, 1536  ;;  %p390_p4 = scmp.lt.s32.totalorder %s19_s15, %s19_s15 }
   0xd   :  { %p386_p3 = scmp.ne.s32.totalorder %s19_s15, %s385_s2  ;;  %p391_p5 = scmp.lt.s32.totalorder %s385_s2, %s385_s2 }
   0xf   :  { %p392_p6 = por %p391_p5, %p390_p4 }
  0x11   :  { %p393_p7 = pnand %p392_p6, %p386_p3 }
  0x13   :  { %396 = shalt.err (!%p393_p7)
}
  0x14   :  { %s448_s23 = smov 768   ;;  %s449_s24 = smov 48  }
  0x15   :  { %24 = dma.hbm_to_vmem [thread:$0]  %s545_s0, 1536, %s19_s15, [#allocation5], %s448_s23, %s448_s23, %s449_s24  }
  0x16   :  { %s450_s27 = smov [#allocation7]   ;;  %s397_s4 = scalar_lea.hbm %s546_s1, 96 }
  0x17   :  { %s31_s28 = sshll.u32 %s450_s27, 4  ;;  %p398_p8 = scmp.ne.s32.totalorder %s546_s1, %s397_s4  ;;  %s32_s28 = int_to_ptr.vmem [resolvable:$true] %s31_s28 }
  0x18   :  { %p401_p9 = scmp.lt.u32.totalorder %s397_s4, %s546_s1 }
  0x1a   :  { %p403_p10 = pnand %p401_p9, %p398_p8 }
  0x1c   :  { %406 = shalt.err (!%p403_p10)
}
  0x1d   :  { %s407_s9 = scalar_lea.vmem %s32_s28, 96  ;;  %p412_p12 = scmp.lt.s32.totalorder %s32_s28, %s32_s28 }
  0x1e   :  { %p408_p11 = scmp.ne.s32.totalorder %s32_s28, %s407_s9  ;;  %p413_p13 = scmp.lt.s32.totalorder %s407_s9, %s407_s9 }
  0x20   :  { %p414_p0 = por %p413_p13, %p412_p12 }
  0x22   :  { %p415_p1 = pnand %p414_p0, %p408_p11 }
  0x24   :  { %418 = shalt.err (!%p415_p1)
}
  0x25   :  { %34 = dma.hbm_to_vmem [thread:$0]  %s546_s1, 96, %s32_s28, [#allocation8]  }
  0x26   :  { %441 = dma.done.wait [#allocation5], 1536  }
  0x27   :  { %442 = vsyncadd [#allocation5], 4294965760 }
  0x28   :  { %443 = dma.done.wait [#allocation8], 96  }
  0x29   :  { %444 = vsyncadd [#allocation8], 4294967200  ;;  %v451_v1 = vmov 0.0   ;;  %v51_v2 = vld [vmem:[#allocation4] sm:$0xff]  ;;  %v52_v3 = vld [vmem:[#allocation4 + $0x8] sm:$0xff]  ;;  %v152_v9 = vlaneseq  ;;  %vm202_vm0 = vcmask 1041409  }
  0x2a   :  { %48 = vst [vmem:[#allocation2 + $0x8] sm:$0xf] %v451_v1  ;;  %v53_v4 = vld [vmem:[#allocation4 + $0x10] sm:$0xff]  ;;  %v54_v5 = vld [vmem:[#allocation4 + $0x18] sm:$0xff]  ;;  %v55_v6 = vld [vmem:[#allocation4 + $0x20] sm:$0xff]  ;;  %v63_v7 = vrot.slane %v51_v2, 4 }
  0x2b   :  { %v69_v8 = vrot.slane %v52_v3, 4  ;;  %v56_v10 = vld [vmem:[#allocation4 + $0x28] sm:$0xff]  ;;  %v57_v11 = vld [vmem:[#allocation4 + $0x30] sm:$0xff]  ;;  %v58_v12 = vld [vmem:[#allocation4 + $0x38] sm:$0xff]  ;;  %v75_v13 = vrot.slane %v53_v4, 4  ;;  %v81_v14 = vrot.slane %v54_v5, 4 }
  0x2c   :  { %v87_v15 = vrot.slane %v55_v6, 4  ;;  %v452_v16 = vmov 1983009808   ;;  %v64_v18 = vadd.f32 %v63_v7, %v51_v2  ;;  %v93_v20 = vrot.slane %v56_v10, 4  ;;  %v59_v42 = vld [vmem:[#allocation4 + $0x40] sm:$0xff]  ;;  %v60_v43 = vld [vmem:[#allocation4 + $0x48] sm:$0xff] }
  0x2d   :  { %v501_v17 = vunpack.c.l.s4 %v452_v16  ;;  %v70_v19 = vadd.f32 %v69_v8, %v52_v3  ;;  %v99_v21 = vrot.slane %v57_v11, 4  ;;  %v76_v22 = vadd.f32 %v75_v13, %v53_v4  ;;  %v61_v48 = vld [vmem:[#allocation4 + $0x50] sm:$0xff]  ;;  %v62_v49 = vld [vmem:[#allocation4 + $0x58] sm:$0xff]  ;;  %s453_s1 = smov [#allocation9]  }
  0x2e   :  { %v82_v23 = vadd.f32 %v81_v14, %v54_v5  ;;  %v88_v24 = vadd.f32 %v87_v15, %v55_v6  ;;  %v105_v25 = vrot.slane %v58_v12, 4  ;;  %v65_v26 = vrot.slane %v64_v18, 2  ;;  %s352_s11 = sshll.u32 %s453_s1, 4  ;;  %s353_s11 = int_to_ptr.vmem [resolvable:$true] %s352_s11 }
  0x2f   :  { %v71_v27 = vrot.slane %v70_v19, 2  ;;  %v94_v28 = vadd.f32 %v93_v20, %v56_v10  ;;  %v100_v29 = vadd.f32 %v99_v21, %v57_v11  ;;  %v77_v30 = vrot.slane %v76_v22, 2  ;;  %v228_v21 = vld [vmem:[#allocation7] sm:$0x3f]  ;;  %s419_s12 = scalar_lea.vmem %s353_s11, 32  ;;  %p424_p3 = scmp.lt.s32.totalorder %s353_s11, %s353_s11 }
  0x30   :  { %v83_v31 = vrot.slane %v82_v23, 2  ;;  %v89_v32 = vrot.slane %v88_v24, 2  ;;  %v106_v33 = vadd.f32 %v105_v25, %v58_v12  ;;  %v66_v34 = vadd.f32 %v65_v26, %v64_v18  ;;  %p420_p2 = scmp.ne.s32.totalorder %s353_s11, %s419_s12  ;;  %p425_p4 = scmp.lt.s32.totalorder %s419_s12, %s419_s12 }
  0x31   :  { %v72_v35 = vadd.f32 %v71_v27, %v70_v19  ;;  %v95_v36 = vrot.slane %v94_v28, 2  ;;  %v101_v37 = vrot.slane %v100_v29, 2  ;;  %v78_v38 = vadd.f32 %v77_v30, %v76_v22 }
  0x32   :  { %v84_v39 = vadd.f32 %v83_v31, %v82_v23  ;;  %v107_v40 = vrot.slane %v106_v33, 2  ;;  %v67_v44 = vrot.slane %v66_v34, 1  ;;  %v90_v45 = vadd.f32 %v89_v32, %v88_v24  ;;  %p426_p5 = por %p425_p4, %p424_p3 }
  0x33   :  { %v102_v41 = vadd.f32 %v101_v37, %v100_v29  ;;  %v503_v47 = vshrl.u32 %v152_v9, 7  ;;  %v73_v50 = vrot.slane %v72_v35, 1  ;;  %v96_v51 = vadd.f32 %v95_v36, %v94_v28 }
  0x34   :  { %v108_v46 = vadd.f32 %v107_v40, %v106_v33  ;;  %v151_v52 = vunpack.c.0.s8 %v501_v17  ;;  %v79_v53 = vrot.slane %v78_v38, 1  ;;  %v85_v54 = vrot.slane %v84_v39, 1  ;;  %p427_p6 = pnand %p426_p5, %p420_p2 }
  0x35   :  { %v232_v55 = vsub.s32 0, %v503_v47  ;;  %v236_v56 = vsub.s32 1, %v503_v47  ;;  %v103_v57 = vrot.slane %v102_v41, 1  ;;  %v111_v59 = vrot.slane %v59_v42, 4 }
  0x36   :  { %v109_v58 = vrot.slane %v108_v46, 1  ;;  %v117_v60 = vrot.slane %v60_v43, 4  ;;  %v68_v61 = vadd.f32 %v67_v44, %v66_v34  ;;  %v91_v62 = vrot.slane %v90_v45, 1 }
  0x37   :  { %v123_v63 = vrot.slane %v61_v48, 4  ;;  %v129_v0 = vrot.slane %v62_v49, 4  ;;  %v74_v1 = vadd.f32 %v73_v50, %v72_v35  ;;  %v97_v2 = vrot.slane %v96_v51, 1 }
  0x38   :  { %v112_v3 = vadd.f32 %v111_v59, %v59_v42  ;;  %v118_v4 = vadd.f32 %v117_v60, %v60_v43  ;;  %v80_v5 = vadd.f32 %v79_v53, %v78_v38  ;;  %v86_v6 = vadd.f32 %v85_v54, %v84_v39 }
  0x39   :  { %v124_v7 = vadd.f32 %v123_v63, %v61_v48  ;;  %v130_v8 = vadd.f32 %v129_v0, %v62_v49  ;;  %v104_v9 = vadd.f32 %v103_v57, %v102_v41  ;;  %v110_v10 = vadd.f32 %v109_v58, %v108_v46 }
  0x3a   :  { %v113_v11 = vrot.slane %v112_v3, 2  ;;  %v119_v12 = vrot.slane %v118_v4, 2  ;;  %v240_v15 = vsub.s32 2, %v503_v47  ;;  %v244_v16 = vsub.s32 3, %v503_v47 }
  0x3b   :  { %v125_v13 = vrot.slane %v124_v7, 2  ;;  %v131_v14 = vrot.slane %v130_v8, 2  ;;  %v92_v17 = vadd.f32 %v91_v62, %v90_v45  ;;  %v511_v20 = vsub.s32 %v151_v52, %v503_v47 }
  0x3c   :  { %v114_v18 = vadd.f32 %v113_v11, %v112_v3  ;;  %v120_v19 = vadd.f32 %v119_v12, %v118_v4  ;;  %v98_v22 = vadd.f32 %v97_v2, %v96_v51  ;;  %v147_v25 = vcombine.low %v68_v61, %v74_v1  ;;  %v50_v61 = vld [vmem:[#allocation2 + $0x8] sm:$0xf] }
  0x3d   :  { %v126_v23 = vadd.f32 %v125_v13, %v124_v7  ;;  %v132_v24 = vadd.f32 %v131_v14, %v130_v8  ;;  %v148_v28 = vcombine.low %v80_v5, %v86_v6  ;;  %v172_v29 = vcombine.low %v104_v9, %v110_v10 }
  0x3e   :  { %v115_v26 = vrot.slane %v114_v18, 1  ;;  %v121_v27 = vrot.slane %v120_v19, 1  ;;  %v233_v32 = vrot.slane %v228_v21, %v232_v55  ;;  %v237_v33 = vrot.slane %v228_v21, %v236_v56 }
  0x3f   :  { %v127_v30 = vrot.slane %v126_v23, 1  ;;  %v133_v31 = vrot.slane %v132_v24, 1  ;;  %v241_v36 = vrot.slane %v228_v21, %v240_v15  ;;  %v245_v37 = vrot.slane %v228_v21, %v244_v16 }
  0x40   :  { %v116_v34 = vadd.f32 %v115_v26, %v114_v18  ;;  %v122_v35 = vadd.f32 %v121_v27, %v120_v19  ;;  %v164_v40 = vcombine.low %v92_v17, %v98_v22  ;;  %v155_v41 = vrot.slane %v147_v25, %v511_v20 }
  0x41   :  { %v128_v38 = vadd.f32 %v127_v30, %v126_v23  ;;  %v134_v39 = vadd.f32 %v133_v31, %v132_v24  ;;  %v162_v42 = vrot.slane %v148_v28, %v511_v20  ;;  %v180_v44 = vrot.slane %v172_v29, %v511_v20 }
  0x42   :  { %v173_v43 = vcombine.low %v116_v34, %v122_v35  ;;  %v254_v48 = vcombine.low %v233_v32, %v237_v33  ;;  %v255_v49 = vcombine.low %v241_v36, %v245_v37  ;;  %v171_v50 = vrot.slane %v164_v40, %v511_v20  ;;  %v362_v32 = vld [vmem:[#allocation3] ss:$0 sm:$0xff] }
  0x43   :  { %v189_v45 = vcombine.low %v128_v38, %v134_v39  ;;  %v163_v52 = vcombine.low %v155_v41, %v162_v42  ;;  %vm204_vm1 = vcmask 1043459   ;;  %v248_v55 = vsub.s32 4, %v503_v47 }
  0x44   :  { %v187_v46 = vrot.slane %v173_v43, %v511_v20  ;;  %v252_v56 = vsub.s32 5, %v503_v47  ;;  %vm206_vm2 = vcmask 1045509   ;;  %v262_v58 = vrot.slane %v254_v48, %v511_v20 }
  0x45   :  { %v196_v51 = vrot.slane %v189_v45, %v511_v20  ;;  %v269_v59 = vrot.slane %v255_v49, %v511_v20  ;;  %vm208_vm3 = vcmask 1047559   ;;  %v249_v2 = vrot.slane %v228_v21, %v248_v55 }
  0x46   :  { %v188_v53 = vcombine.low %v180_v44, %v187_v46  ;;  %v253_v3 = vrot.slane %v228_v21, %v252_v56  ;;  %vm316_vm4 = vcmask 1041408   ;;  %vm344_vm5 = vcmask 1024  }
  0x47   :  { %v212_v54 = vrot.slane %v196_v51, 7  ;;  %v270_v6 = vcombine.low %v262_v58, %v269_v59 }
  0x48   :  { %v201_v57 = vrot.slane %v188_v53, 7  ;;  %v271_v8 = vcombine.low %v249_v2, %v253_v3 }
  0x49   :  { %v213_v60 = vsel %vm202_vm0, %v212_v54, %v171_v50 }
  0x4a   :  { %v203_v62 = vsel %vm202_vm0, %v201_v57, %v163_v52  ;;  %v214_v63 = vsel %vm204_vm1, %v212_v54, %v213_v60  ;;  %v278_v12 = vrot.slane %v271_v8, %v511_v20 }
  0x4b   :  { %v205_v0 = vsel %vm204_vm1, %v201_v57, %v203_v62  ;;  %v215_v1 = vsel %vm206_vm2, %v212_v54, %v214_v63 }
  0x4c   :  { %v207_v4 = vsel %vm206_vm2, %v201_v57, %v205_v0  ;;  %v216_v5 = vsel %vm208_vm3, %v212_v54, %v215_v1 }
  0x4d   :  { %v209_v7 = vsel %vm208_vm3, %v201_v57, %v207_v4  ;;  %v220_v47 = vadd.f32 %v216_v5, %v50_v61 }
  0x4e   :  { %v281_v9 = vmul.f32 %v270_v6, %v209_v7 }
  0x4f   :  { %222 = vst [vmem:[#allocation2 + $0x8] sm:$0xf] %v220_v47 }
  0x50   :  { %v285_v10 = vcombine.high %v281_v9, %v281_v9  ;;  %v292_v11 = vrot.slane %v281_v9, %v511_v20 }
  0x52   :  { %v299_v13 = vrot.slane %v285_v10, %v511_v20  ;;  %v300_v14 = vcombine.high %v292_v11, %v292_v11  ;;  %v317_v15 = vsel %vm316_vm4, %v292_v11, 0.0 }
  0x54   :  { %v301_v17 = vcombine.high %v299_v13, %v299_v13  ;;  %v318_v18 = vsel %vm316_vm4, %v300_v14, 0.0  ;;  %v320_v19 = vsel %vm316_vm4, %v299_v13, 0.0 }
  0x55   :  { %v319_v22 = vadd.f32 %v318_v18, %v317_v15 }
  0x56   :  { %v227_v16 = vld [vmem:[#allocation2 + $0x8] sm:$0xf]  ;;  %v322_v23 = vsel %vm316_vm4, %v301_v17, 0.0 }
  0x57   :  { %v282_v21 = vmul.f32 %v278_v12, %v227_v16  ;;  %v321_v25 = vadd.f32 %v320_v19, %v319_v22 }
  0x59   :  { %v308_v24 = vrot.slane %v282_v21, %v511_v20  ;;  %v323_v27 = vadd.f32 %v322_v23, %v321_v25 }
  0x5b   :  { %v309_v26 = vcombine.high %v308_v24, %v308_v24  ;;  %v324_v28 = vsel %vm316_vm4, %v308_v24, 0.0 }
  0x5c   :  { %v325_v29 = vadd.f32 %v324_v28, %v323_v27 }
  0x5d   :  { %v326_v30 = vsel %vm316_vm4, %v309_v26, 0.0 }
  0x5e   :  { %v327_v31 = vadd.f32 %v326_v30, %v325_v29 }
  0x60   :  { %328 = vadd.xlane.f32.xlu0 %v327_v31 }
  0xed   :  { %v329_v33 = vpop.xlane.xlu0 %328 }
  0xee   :  { %v337_v34 = vadd.f32 %v362_v32, %v329_v33 }
  0xf0   :  { %v363_v35 = vmul.f32 -1.442695, %v337_v34 }
  0xf2   :  { %371 = vpow2.f32 %v363_v35 }
  0xfc   :  { %v372_v36 = vpop.eup %371 }
  0xfd   :  { %v341_v37 = vadd.f32 1.0, %v372_v36 }
  0xff   :  { %373 = vrcp.f32 %v341_v37 }
 0x109   :  { %v374_v20 = vpop.eup %373 }
 0x10a   :  { %345 = vst.msk [vmem:[#allocation9] sm:$0x3] %vm344_vm5, %v374_v20 }
 0x10b   :  { %430 = shalt.err (!%p427_p6)
}
 0x10c   :  { %s431_s15 = scalar_lea.hbm %s548_s3, 32 }
 0x10d   :  { %p432_p7 = scmp.ne.s32.totalorder %s548_s3, %s431_s15  ;;  %p435_p8 = scmp.lt.u32.totalorder %s431_s15, %s548_s3 }
 0x10f   :  { %p437_p9 = pnand %p435_p8, %p432_p7 }
 0x111   :  { %440 = shalt.err (!%p437_p9)
}
 0x112   :  { %355 = dma.vmem_to_hbm [thread:$0]  %s353_s11, 32, %s548_s3, [#allocation6]  }
 0x113   :  { %445 = dma.done.wait [#allocation6], 32  }
 0x114   :  { %446 = vsyncadd [#allocation6], 4294967264 }
 0x115   :  { %359 = vsyncpa [#allocation5], 1 }
 0x116   :  { %360 = vsyncpa [#allocation8], 1 }
 0x117   :  { %361 = vsyncpa [#allocation6], 1 }

</bundles_post_ra>
